<compile_context>
chip_gen: v7x
topology: tpu7x:2x2x1
jax: 0.10.0
libtpu: 0.0.40
codegen_flags: <defaults>
</compile_context>

<pallas_src>
import jax
import jax.numpy as jnp
from jax.experimental import pallas as pl
from jax.experimental.pallas import tpu as pltpu


# --------------------------------------------------------------------------
# Pass 1: backbone stub (1x1 conv == channel matmul) + fused per-batch sums
# --------------------------------------------------------------------------
def _proj_kernel(x_ref, w_ref, b_ref, o_ref, sums_ref):
    # x_ref: (TM, Cin), w_ref: (Cin, Cout), b_ref: (1, Cout)
    # o_ref: (TM, Cout), sums_ref: (1, 1, Cout) accumulator over the M axis.
    y = (jnp.dot(x_ref[...], w_ref[...], preferred_element_type=jnp.float32)
         + b_ref[...])
    o_ref[...] = y

    @pl.when(pl.program_id(1) == 0)
    def _():
        sums_ref[...] = jnp.zeros_like(sums_ref)

    sums_ref[0] += jnp.sum(y, axis=0, keepdims=True)


def _pick_row_tile(hw, target=512):
    # Largest divisor of hw that is <= target and a multiple of 8.
    for t in range(min(target, hw), 7, -1):
        if hw % t == 0 and t % 8 == 0:
            return t
    return hw


def backbone_stub_with_pool(x_nhwc, w, b):
    """Returns (feat (B,H,W,Cout), per-batch channel means (B,Cout))."""
    B, H, W, Cin = x_nhwc.shape
    Cout = w.shape[1]
    HW = H * W
    TM = _pick_row_tile(HW)
    MT = HW // TM
    x2 = x_nhwc.reshape(B * HW, Cin)

    feat_flat, sums = pl.pallas_call(
        _proj_kernel,
        out_shape=(jax.ShapeDtypeStruct((B * HW, Cout), jnp.float32),
                   jax.ShapeDtypeStruct((B, 1, Cout), jnp.float32)),
        grid=(B, MT),
        in_specs=[pl.BlockSpec((TM, Cin), lambda bi, m: (bi * MT + m, 0)),
                  pl.BlockSpec((Cin, Cout), lambda bi, m: (0, 0)),
                  pl.BlockSpec((1, Cout), lambda bi, m: (0, 0))],
        out_specs=(pl.BlockSpec((TM, Cout), lambda bi, m: (bi * MT + m, 0)),
                   pl.BlockSpec((1, 1, Cout), lambda bi, m: (bi, 0, 0))),
        compiler_params=pltpu.CompilerParams(
            dimension_semantics=("parallel", "arbitrary")),
        cost_estimate=pl.CostEstimate(
            flops=2 * B * HW * Cin * Cout,
            transcendentals=0,
            bytes_accessed=4 * (B * HW * (Cin + Cout) + Cin * Cout
                                + (B + 1) * Cout)),
    )(x2, w, b.reshape(1, Cout))

    feat = feat_flat.reshape(B, H, W, Cout)
    mean = sums.reshape(B, Cout) / float(HW)          # AdaptiveAvgPool2d(1)
    return feat, mean


# --------------------------------------------------------------------------
# Pass 2: fused scSE (channel-SE multiply + 7x7 spatial conv + sigmoid + mul)
# --------------------------------------------------------------------------
# W-axis offset where the interior is stored inside the padded VMEM scratch.
# 8 keeps the store sublane-aligned; the logical 3-pixel halo then lives at
# columns [5..7] / [W+8..W+10] which are zero-filled.
_PW_OFF = 8


def _scse_kernel(x_ref, attc_ref, wk_ref, bk_ref, o_ref, pad_ref):
    # x_ref:   (1, H, W, C)   raw features
    # attc_ref:(1, 1, C)      channel attention (already sigmoid'ed)
    # wk_ref:  (49, C)        7x7 conv weights, tap-major
    # bk_ref:  (1, 1)         conv bias
    # o_ref:   (1, H, W, C)
    # pad_ref: (H+6, W+16, C) zero-padded VMEM scratch (halo built on-chip)
    x = x_ref[0]                                    # (H, W, C)
    H, W, C = x.shape

    xcw = x * attc_ref[0]                           # x * channel_attention

    # Build the zero halo in VMEM; no HBM-side pad array.
    pad_ref[...] = jnp.zeros_like(pad_ref)
    pad_ref[3:3 + H, _PW_OFF:_PW_OFF + W, :] = xcw
    xpad = pad_ref[...]                             # (H+6, W+16, C)

    wk = wk_ref[...]                                # (49, C)

    # 49 taps as (H, W, C) FMAs; one channel reduction at the end.
    acc = jnp.zeros((H, W, C), jnp.float32)
    for ki in range(7):
        for kj in range(7):
            win = xpad[ki:ki + H, _PW_OFF - 3 + kj:_PW_OFF - 3 + kj + W, :]
            t = ki * 7 + kj
            acc = acc + win * wk[t:t + 1, :]
    s = jnp.sum(acc, axis=-1)                       # (H, W) single reduction

    att_s = jax.nn.sigmoid(s + bk_ref[...])         # (H, W)
    o_ref[0] = xcw * att_s[:, :, None]              # x * spatial_attention


def scse_fused(feat, att_c, wk, bk):
    B, H, W, C = feat.shape
    return pl.pallas_call(
        _scse_kernel,
        out_shape=jax.ShapeDtypeStruct((B, H, W, C), jnp.float32),
        grid=(B,),
        in_specs=[pl.BlockSpec((1, H, W, C), lambda b: (b, 0, 0, 0)),
                  pl.BlockSpec((1, 1, C), lambda b: (b, 0, 0)),
                  pl.BlockSpec((49, C), lambda b: (0, 0)),
                  pl.BlockSpec((1, 1), lambda b: (0, 0))],
        out_specs=pl.BlockSpec((1, H, W, C), lambda b: (b, 0, 0, 0)),
        scratch_shapes=[pltpu.VMEM((H + 6, W + 16, C), jnp.float32)],
        compiler_params=pltpu.CompilerParams(
            dimension_semantics=("parallel",)),
        cost_estimate=pl.CostEstimate(
            flops=B * H * W * C * (2 * 49 + 3),
            transcendentals=B * H * W,
            bytes_accessed=4 * (2 * B * H * W * C + B * C + 49 * C + 1)),
    )(feat, att_c.reshape(B, 1, C), wk.reshape(49, C), bk.reshape(1, 1))


# --------------------------------------------------------------------------
# Wrapper (NCHW in / NCHW out, matches the PyTorch forward at eval time)
# --------------------------------------------------------------------------
def pspnet_with_attention(x_nchw, params):
    x = jnp.transpose(x_nchw, (0, 2, 3, 1)).astype(jnp.float32)   # NCHW->NHWC

    # Backbone stub + fused global-average-pool sums.
    feat, mean = backbone_stub_with_pool(x, params['proj_w'], params['proj_b'])

    # Channel-SE squeeze path: two tiny 1x1 convs on (B, C) — plain JAX.
    z1 = jnp.maximum(mean @ params['se_w1'] + params['se_b1'], 0.0)
    att_c = jax.nn.sigmoid(z1 @ params['se_w2'] + params['se_b2'])  # (B, C)

    # Fused channel-scale + spatial-SE kernel.
    y = scse_fused(feat, att_c, params['sp_w'], params['sp_b'])

    # Dropout2d (inside scSE and outer) -> identity at inference.
    return jnp.transpose(y, (0, 3, 1, 2))                          # NHWC->NCHW


# --------------------------------------------------------------------------
# Pure-JAX reference (for correctness check)
# --------------------------------------------------------------------------
def _reference(x_nchw, params):
    x = jnp.transpose(x_nchw, (0, 2, 3, 1)).astype(jnp.float32)
    B, H, W, Cin = x.shape
    feat = x.reshape(-1, Cin) @ params['proj_w'] + params['proj_b']
    C = feat.shape[-1]
    feat = feat.reshape(B, H, W, C)
    mean = feat.mean(axis=(1, 2))                                  # (B, C)
    z1 = jnp.maximum(mean @ params['se_w1'] + params['se_b1'], 0.0)
    att_c = jax.nn.sigmoid(z1 @ params['se_w2'] + params['se_b2'])
    xc = feat * att_c[:, None, None, :]
    kern = params['sp_w'][..., None]                               # (7,7,C,1)
    conv = jax.lax.conv_general_dilated(
        xc, kern, window_strides=(1, 1), padding=((3, 3), (3, 3)),
        dimension_numbers=('NHWC', 'HWIO', 'NHWC')) + params['sp_b']
    att_s = jax.nn.sigmoid(conv)
    y = xc * att_s
    return jnp.transpose(y, (0, 3, 1, 2))


if __name__ == "__main__":
    B, Cin, Cout, H, W = 2, 4, 8, 16, 16
    Cr = max(Cout // 4, 1)

    key = jax.random.PRNGKey(0)
    ks = jax.random.split(key, 9)
    x = jax.random.normal(ks[0], (B, Cin, H, W), dtype=jnp.float32)

    params = {
        'proj_w': 0.2 * jax.random.normal(ks[1], (Cin, Cout), jnp.float32),
        'proj_b': 0.1 * jax.random.normal(ks[2], (Cout,), jnp.float32),
        'se_w1': 0.3 * jax.random.normal(ks[3], (Cout, Cr), jnp.float32),
        'se_b1': 0.1 * jax.random.normal(ks[4], (Cr,), jnp.float32),
        'se_w2': 0.3 * jax.random.normal(ks[5], (Cr, Cout), jnp.float32),
        'se_b2': 0.1 * jax.random.normal(ks[6], (Cout,), jnp.float32),
        'sp_w': 0.1 * jax.random.normal(ks[7], (7, 7, Cout), jnp.float32),
        'sp_b': 0.1 * jax.random.normal(ks[8], (1,), jnp.float32),
    }

    out = jax.block_until_ready(pspnet_with_attention(x, params))
    ref = jax.block_until_ready(_reference(x, params))
    assert out.shape == (B, Cout, H, W), out.shape
    assert jnp.allclose(out, ref, atol=1e-4, rtol=1e-4), "mismatch vs reference"
    print("KERNEL_OK")
</pallas_src>

<mosaic_0001>
module attributes {stable_mosaic.version = 11 : i64} {
  func.func @_proj_kernel(%arg0: i32, %arg1: i32, %arg2: memref<256x4xf32, #tpu.memory_space<vmem>>, %arg3: memref<4x8xf32, #tpu.memory_space<vmem>>, %arg4: memref<1x8xf32, #tpu.memory_space<vmem>>, %arg5: memref<256x8xf32, #tpu.memory_space<vmem>>, %arg6: memref<1x1x8xf32, #tpu.memory_space<vmem>>) attributes {dimension_semantics = [#tpu.dimension_semantics<parallel>, #tpu.dimension_semantics<arbitrary>], iteration_bounds = array<i64: 2, 1>, scalar_prefetch = 0 : i64, scratch_operands = 0 : i64, tpu.core_type = #tpu.core_type<tc>, window_params = [{transform_indices = @transform_0, window_bounds = array<i64: 256, 4>}, {pipeline_mode = #tpu.pipeline_mode<synchronous>, transform_indices = @transform_1, window_bounds = array<i64: 4, 8>}, {pipeline_mode = #tpu.pipeline_mode<synchronous>, transform_indices = @transform_2, window_bounds = array<i64: 1, 8>}, {transform_indices = @transform_3, window_bounds = array<i64: 256, 8>}, {transform_indices = @transform_4, window_bounds = array<i64: 1, 1, 8>}]} {
    %c0 = arith.constant 0 : index
    %c0_0 = arith.constant 0 : index
    %0 = vector.load %arg2[%c0, %c0_0] : memref<256x4xf32, #tpu.memory_space<vmem>>, vector<256x4xf32>
    %c0_1 = arith.constant 0 : index
    %c0_2 = arith.constant 0 : index
    %1 = vector.load %arg3[%c0_1, %c0_2] : memref<4x8xf32, #tpu.memory_space<vmem>>, vector<4x8xf32>
    %cst = arith.constant dense<0.000000e+00> : vector<256x8xf32>
    %2 = tpu.matmul %0, %1, %cst {dimension_numbers = #tpu.dot_dimension_numbers<[1], [0], [0], [1], [0, 0, 1, 1], [], []>} : vector<256x4xf32>, vector<4x8xf32>, vector<256x8xf32> -> vector<256x8xf32>
    %c0_3 = arith.constant 0 : index
    %c0_4 = arith.constant 0 : index
    %3 = vector.load %arg4[%c0_3, %c0_4] : memref<1x8xf32, #tpu.memory_space<vmem>>, vector<1x8xf32>
    %4 = vector.broadcast %3 : vector<1x8xf32> to vector<256x8xf32>
    %5 = arith.addf %2, %4 : vector<256x8xf32>
    %c0_5 = arith.constant 0 : index
    %c0_6 = arith.constant 0 : index
    %6 = vector.load %arg5[%c0_5, %c0_6] : memref<256x8xf32, #tpu.memory_space<vmem>>, vector<256x8xf32>
    tpu.vector_store %arg5[%c0_5, %c0_6], %5 {strides = array<i32>} : memref<256x8xf32, #tpu.memory_space<vmem>>, vector<256x8xf32>,
    %c0_i32 = arith.constant 0 : i32
    %7 = arith.cmpi eq, %arg1, %c0_i32 : i32
    %8 = arith.extui %7 : i1 to i32
    %c0_i32_7 = arith.constant 0 : i32
    %9 = arith.cmpi ne, %8, %c0_i32_7 : i32
    scf.if %9 {
      %cst_15 = arith.constant 0.000000e+00 : f32
      %18 = vector.broadcast %cst_15 : f32 to vector<1x1x8xf32>
      %c0_16 = arith.constant 0 : index
      %c0_17 = arith.constant 0 : index
      %c0_18 = arith.constant 0 : index
      %19 = vector.load %arg6[%c0_16, %c0_17, %c0_18] : memref<1x1x8xf32, #tpu.memory_space<vmem>>, vector<1x1x8xf32>
      tpu.vector_store %arg6[%c0_16, %c0_17, %c0_18], %18 {strides = array<i32>} : memref<1x1x8xf32, #tpu.memory_space<vmem>>, vector<1x1x8xf32>,
    } else {
    }
    %c0_8 = arith.constant 0 : index
    %c0_9 = arith.constant 0 : index
    %c0_10 = arith.constant 0 : index
    %10 = vector.load %arg6[%c0_8, %c0_9, %c0_10] : memref<1x1x8xf32, #tpu.memory_space<vmem>>, vector<1x1x8xf32>
    %11 = vector.shape_cast %10 : vector<1x1x8xf32> to vector<1x8xf32>
    %cst_11 = arith.constant dense<0.000000e+00> : vector<8xf32>
    %12 = vector.multi_reduction <add>, %5, %cst_11 [0] : vector<256x8xf32> to vector<8xf32>
    %13 = vector.shape_cast %12 : vector<8xf32> to vector<1x8xf32>
    %14 = arith.addf %11, %13 : vector<1x8xf32>
    %c0_12 = arith.constant 0 : index
    %c0_13 = arith.constant 0 : index
    %c0_14 = arith.constant 0 : index
    %15 = vector.load %arg6[%c0_12, %c0_13, %c0_14] : memref<1x1x8xf32, #tpu.memory_space<vmem>>, vector<1x1x8xf32>
    %16 = vector.shape_cast %15 : vector<1x1x8xf32> to vector<1x8xf32>
    %17 = vector.shape_cast %14 : vector<1x8xf32> to vector<1x1x8xf32>
    tpu.vector_store %arg6[%c0_12, %c0_13, %c0_14], %17 {strides = array<i32>} : memref<1x1x8xf32, #tpu.memory_space<vmem>>, vector<1x1x8xf32>,
    return
  }
  func.func @transform_0(%arg0: i32, %arg1: i32) -> (i32, i32) {
    %c1_i32 = arith.constant 1 : i32
    %0 = arith.muli %arg0, %c1_i32 : i32
    %1 = arith.addi %0, %arg1 : i32
    %c0_i32 = arith.constant 0 : i32
    %c0_i32_0 = arith.constant 0 : i32
    return %1, %c0_i32 : i32, i32
  }
  func.func @transform_1(%arg0: i32, %arg1: i32) -> (i32, i32) {
    %c0_i32 = arith.constant 0 : i32
    %c0_i32_0 = arith.constant 0 : i32
    %c0_i32_1 = arith.constant 0 : i32
    return %c0_i32, %c0_i32_0 : i32, i32
  }
  func.func @transform_2(%arg0: i32, %arg1: i32) -> (i32, i32) {
    %c0_i32 = arith.constant 0 : i32
    %c0_i32_0 = arith.constant 0 : i32
    %c0_i32_1 = arith.constant 0 : i32
    return %c0_i32, %c0_i32_0 : i32, i32
  }
  func.func @transform_3(%arg0: i32, %arg1: i32) -> (i32, i32) {
    %c1_i32 = arith.constant 1 : i32
    %0 = arith.muli %arg0, %c1_i32 : i32
    %1 = arith.addi %0, %arg1 : i32
    %c0_i32 = arith.constant 0 : i32
    %c0_i32_0 = arith.constant 0 : i32
    return %1, %c0_i32 : i32, i32
  }
  func.func @transform_4(%arg0: i32, %arg1: i32) -> (i32, i32, i32) {
    %c0_i32 = arith.constant 0 : i32
    %c0_i32_0 = arith.constant 0 : i32
    %c0_i32_1 = arith.constant 0 : i32
    return %arg0, %c0_i32, %c0_i32_0 : i32, i32, i32
  }
}

</mosaic_0001>

<bundles_post_ra>
// kernel: tpu_custom_call.1
= control target key start
LH: loop header
LB: loop body
LE: loop exit
PB: predicated region body
PF: predicated region fallthrough
CT: control target
= control target key end

     0   :  { %10 = vsyncpa [#allocation3], 0  ;;  %s1493_s0 = inlined_call_operand.vmem [shape: f32[512,4], index: 0, kind: input, shape index: {}]   ;;  %s1494_s1 = inlined_call_operand.vmem [shape: f32[4,8], index: 1, kind: input, shape index: {}]   ;;  %s1495_s2 = inlined_call_operand.vmem [shape: f32[1,8], index: 2, kind: input, shape index: {}]   ;;  %s1496_s3 = inlined_call_operand.vmem [shape: f32[512,8], index: 3, kind: output, shape index: {0}]   ;;  %s1497_s4 = inlined_call_operand.hbm [shape: f32[2,1,8], index: 4, kind: output, shape index: {1}]  }
   0x1   :  { %12 = vsyncpa [#allocation3 + $0x1], 0  ;;  %s1120_s15 = smov 0   ;;  %s1122_s16 = smov 0  }
   0x2   :  { %s1124_s17 = smov 0   ;;  %s1126_s18 = smov 0  }
   0x3   :  { %s1128_s19 = smov 0   ;;  %s1130_s20 = smov 0  }
   0x4 LB: > { %s826_s21 = sadd.s32 4294967295, %s1091_s20   ;;  %s827_s22 = sadd.s32 4294967294, %s1091_s20   ;;  %s1091_s20 = sphi %s1130_s20, %s18_s20   ;;  %s1087_s19 = sphi %s1128_s19, %s1504_s19   ;;  %s1083_s18 = sphi %s1126_s18, %s1503_s18   ;;  %s1079_s17 = sphi %s1124_s17, %s1502_s17   ;;  %s1075_s16 = sphi %s1122_s16, %s1501_s16   ;;  %s1071_s15 = sphi %s1120_s15, %s1500_s15  }
   0x5   : > { %s30_s23 = sadd.s32 1, %s1087_s19  ;;  %s135_s24 = sadd.s32 1, %s1079_s17 }
   0x6   : > { %p32_p0 = scmp.ge.s32.totalorder %s30_s23, 2  ;;  %p145_p1 = scmp.ne.s32.totalorder %s1079_s17, %s1075_s16 }
   0x7   : > { %p146_p2 = scmp.eq.s32.totalorder %s826_s21, 1  ;;  %p151_p3 = scmp.ne.s32.totalorder %s1075_s16, %s1071_s15 }
   0x8   : > { %s1506_s23 = smov (%p32_p0, %s30_s23), 0  ;;  %p152_p5 = scmp.eq.s32.totalorder %s827_s22, 1 }
   0x9   : > { %p1160_p4 = por %p146_p2, %p145_p1  ;;  %s132_s26 = ssub.s32 %s1087_s19, %s1506_s23 }
   0xa   : > { %p830_p6 = scmp.ge.s32.totalorder %s1091_s20, 1  ;;  %p133_p7 = scmp.eq.s32.totalorder %s132_s26, 0 }
   0xb   : > { %p1167_p8 = por %p152_p5, %p151_p3  ;;  %p187_p9 = scmp.lt.s32.totalorder %s1091_s20, 3 }
   0xc   : > { %s1173_s28 = scalar_select %p133_p7, %s1079_s17, %s135_s24  }
   0xd   : > { %p188_p10 = pnand %p830_p6, %p187_p9 }
   0xe   : > { %v267_v0 = vld [vmem:[%s1494_s1] sm:$0xf] (!%p188_p10)  ;;  %vm372_vm0 = vcmask (!%p188_p10), 1043456   ;;  %s831_s5 = sshll.u32 (!%p188_p10), %s1083_s18, 5  ;;  %vm275_vm1 = vcmask (!%p188_p10), 31744   ;;  %s217_s10 = sand.u32 (!%p188_p10), 1, %s1075_s16  }
   0xf   : > { %191 = sbr.rel (%p188_p10) target bundleno = 335 (0x14f), region = 32  ;;  %905 = vmatprep.subr.msk.mxu0 (!%p188_p10), %vm372_vm0, %v267_v0  ;;  %p221_p11 = scmp.lt.s32.totalorder (!%p188_p10), %s831_s5, 63  ;;  %955 = vmatprep.subr.msk.mxu1 (!%p188_p10), %vm372_vm0, %v267_v0  ;;  %vm638_vm2 = vcmask (!%p188_p10), 57344   ;;  %v1093_v33 = vmov (!%p188_p10), 0.0   ;;  %v1263_v34 = vld [vmem:[%s1495_s2] ss:$0 sm:$0xff] (!%p188_p10) }
  0x10   : > { %906 = vmatpush3.msk.msra.mxu0 (!%p188_p10), %vm372_vm0, %v267_v0  ;;  %956 = vmatpush3.msk.msra.mxu1 (!%p188_p10), %vm372_vm0, %v267_v0  ;;  %s1256_s11 = scalar_lea.vmem (!%p188_p10), [#allocation2], %s217_s10  ;;  %vm601_vm3 = vcmask (!%p188_p10), 64512   ;;  %s869_s24 = sshll.u32 (!%p188_p10), %s1083_s18, 4 }
  0x11   : > { %639 = vst.msk [vmem:[%s1256_s11] sm:$0x1] (!%p188_p10), %vm638_vm2, %v1093_v33  ;;  %s737_s26 = sshll.u32 (!%p188_p10), %s1256_s11, 4  ;;  %s1094_s18 = smov (!%p188_p10), [#allocation2]   ;;  %s1444_s26 = int_to_ptr.vmem [resolvable:$true] %s737_s26 }
  0x12   : > { %s1013_s7 = scalar_lea.vmem (!%p188_p10), %s1444_s26, 16  ;;  %s1017_s8 = sshll.u32 (!%p188_p10), %s1094_s18, 4  ;;  %s1018_s8 = int_to_ptr.vmem [resolvable:$false] %s1017_s8 }
  0x13   : > { %p1014_p12 = scmp.ne.s32.totalorder (!%p188_p10), %s1444_s26, %s1013_s7  ;;  %p1020_p1 = scmp.lt.s32.totalorder (!%p188_p10), %s1444_s26, %s1018_s8 }
  0x15   : > { %p1015_p13 = pnand (!%p188_p10), %p1014_p12, %p1160_p4 }
  0x16   : > { %s1508_s5 = smov (!%p221_p11, %s831_s5), 63 }
  0x17   : > { %s832_s6 = sshll.u32 %s1508_s5, 3  ;;  %s1442_s5 = scalar_lea.hbm %s1497_s4, %s869_s24 }
  0x18   : > { %s1187_s9 = scalar_lea.vmem %s1493_s0, %s832_s6  ;;  %s1270_s22 = scalar_lea.vmem %s1496_s3, %s832_s6 }
  0x19   : > { %v235_v1 = vld [vmem:[%s1187_s9] sm:$0xff]  ;;  %v236_v2 = vld [vmem:[%s1187_s9 + $0x8] sm:$0xff]  ;;  %v237_v3 = vld [vmem:[%s1187_s9 + $0x10] sm:$0xff]  ;;  %s720_s6 = scalar_lea.sflag [#allocation3], %s217_s10  ;;  %p1016_p0 = pneg %p1015_p13 }
  0x1a   : > { %907 = vmatprep.mubr.msk.f32.mxu0 %vm275_vm1, %v235_v1  ;;  %v238_v4 = vld [vmem:[%s1187_s9 + $0x18] sm:$0xff]  ;;  %v239_v5 = vld [vmem:[%s1187_s9 + $0x20] sm:$0xff]  ;;  %v252_v7 = vld [vmem:[%s1187_s9 + $0x88] sm:$0xff] }
  0x1b   : > { %908 = vmatmul.mubr.msk.f32.vlgmr.msra.gmra.mrb[0].mxu0 %vm275_vm1, %v236_v2  ;;  %v251_v6 = vld [vmem:[%s1187_s9 + $0x80] sm:$0xff]  ;;  %v253_v8 = vld [vmem:[%s1187_s9 + $0x90] sm:$0xff]  ;;  %v240_v9 = vld [vmem:[%s1187_s9 + $0x28] sm:$0xff] }
  0x1c   : > { %910 = vmatprep.mubr.msk.f32.mxu0 %vm275_vm1, %v237_v3  ;;  %931 = vmatprep.mubr.msk.f32.mxu1 %vm275_vm1, %v251_v6  ;;  %v241_v10 = vld [vmem:[%s1187_s9 + $0x30] sm:$0xff]  ;;  %v254_v11 = vld [vmem:[%s1187_s9 + $0x98] sm:$0xff]  ;;  %v255_v12 = vld [vmem:[%s1187_s9 + $0xa0] sm:$0xff] }
  0x1d   : > { %932 = vmatmul.mubr.msk.f32.vlgmr.msra.gmra.mrb[0].mxu1 %vm275_vm1, %v252_v7  ;;  %v242_v13 = vld [vmem:[%s1187_s9 + $0x38] sm:$0xff]  ;;  %v243_v14 = vld [vmem:[%s1187_s9 + $0x40] sm:$0xff]  ;;  %v256_v15 = vld [vmem:[%s1187_s9 + $0xa8] sm:$0xff] }
  0x1e   : > { %934 = vmatprep.mubr.msk.f32.mxu1 %vm275_vm1, %v253_v8  ;;  %v257_v16 = vld [vmem:[%s1187_s9 + $0xb0] sm:$0xff]  ;;  %v244_v17 = vld [vmem:[%s1187_s9 + $0x48] sm:$0xff]  ;;  %v258_v19 = vld [vmem:[%s1187_s9 + $0xb8] sm:$0xff] }
  0x1f   : > { %911 = vmatmul.mubr.msk.f32.gmra.mrb[2].mxu0 %vm275_vm1, %v238_v4  ;;  %v245_v18 = vld [vmem:[%s1187_s9 + $0x50] sm:$0xff]  ;;  %v259_v20 = vld [vmem:[%s1187_s9 + $0xc0] sm:$0xff]  ;;  %v246_v21 = vld [vmem:[%s1187_s9 + $0x58] sm:$0xff] }
  0x20   : > { %913 = vmatprep.mubr.msk.f32.mxu0 %vm275_vm1, %v239_v5  ;;  %v247_v22 = vld [vmem:[%s1187_s9 + $0x60] sm:$0xff]  ;;  %v260_v23 = vld [vmem:[%s1187_s9 + $0xc8] sm:$0xff]  ;;  %v261_v24 = vld [vmem:[%s1187_s9 + $0xd0] sm:$0xff] }
  0x21   : > { %935 = vmatmul.mubr.msk.f32.gmra.mrb[2].mxu1 %vm275_vm1, %v254_v11  ;;  %v248_v25 = vld [vmem:[%s1187_s9 + $0x68] sm:$0xff]  ;;  %v249_v26 = vld [vmem:[%s1187_s9 + $0x70] sm:$0xff]  ;;  %v262_v27 = vld [vmem:[%s1187_s9 + $0xd8] sm:$0xff] }
  0x22   : > { %937 = vmatprep.mubr.msk.f32.mxu1 %vm275_vm1, %v255_v12  ;;  %v263_v28 = vld [vmem:[%s1187_s9 + $0xe0] sm:$0xff]  ;;  %v250_v29 = vld [vmem:[%s1187_s9 + $0x78] sm:$0xff]  ;;  %v264_v30 = vld [vmem:[%s1187_s9 + $0xe8] sm:$0xff] }
  0x23   : > { %914 = vmatmul.mubr.msk.f32.gmra.mrb[4].mxu0 %vm275_vm1, %v240_v9  ;;  %v265_v31 = vld [vmem:[%s1187_s9 + $0xf0] sm:$0xff]  ;;  %v266_v32 = vld [vmem:[%s1187_s9 + $0xf8] sm:$0xff]  ;;  %s1019_s9 = scalar_lea.vmem %s1018_s8, 32 }
  0x24   : > { %916 = vmatprep.mubr.msk.f32.mxu0 %vm275_vm1, %v241_v10  ;;  %p1021_p2 = scmp.lt.s32.totalorder %s1019_s9, %s1013_s7 }
  0x25   : > { %938 = vmatmul.mubr.msk.f32.gmra.mrb[4].mxu1 %vm275_vm1, %v256_v15 }
  0x26   : > { %940 = vmatprep.mubr.msk.f32.mxu1 %vm275_vm1, %v257_v16  ;;  %p1022_p3 = por %p1021_p2, %p1020_p1 }
  0x27   : > { %917 = vmatmul.mubr.msk.f32.gmra.mrb[6].mxu0 %vm275_vm1, %v242_v13 }
  0x28   : > { %919 = vmatprep.mubr.msk.f32.mxu0 %vm275_vm1, %v243_v14  ;;  %p1023_p5 = pnand %p1022_p3, %p1016_p0 }
  0x29   : > { %941 = vmatmul.mubr.msk.f32.gmra.mrb[6].mxu1 %vm275_vm1, %v258_v19 }
  0x2a   : > { %943 = vmatprep.mubr.msk.f32.mxu1 %vm275_vm1, %v259_v20 }
  0x2b   : > { %920 = vmatmul.mubr.msk.f32.gmra.mrb[8].mxu0 %vm275_vm1, %v244_v17 }
  0x2c   : > { %922 = vmatprep.mubr.msk.f32.mxu0 %vm275_vm1, %v245_v18 }
  0x2d   : > { %944 = vmatmul.mubr.msk.f32.gmra.mrb[8].mxu1 %vm275_vm1, %v260_v23 }
  0x2e   : > { %946 = vmatprep.mubr.msk.f32.mxu1 %vm275_vm1, %v261_v24 }
  0x2f   : > { %923 = vmatmul.mubr.msk.f32.gmra.mrb[10].mxu0 %vm275_vm1, %v246_v21 }
  0x30   : > { %925 = vmatprep.mubr.msk.f32.mxu0 %vm275_vm1, %v247_v22 }
  0x31   : > { %947 = vmatmul.mubr.msk.f32.gmra.mrb[10].mxu1 %vm275_vm1, %v262_v27 }
  0x32   : > { %949 = vmatprep.mubr.msk.f32.mxu1 %vm275_vm1, %v263_v28 }
  0x33   : > { %926 = vmatmul.mubr.msk.f32.gmra.mrb[12].mxu0 %vm275_vm1, %v248_v25 }
  0x34   : > { %928 = vmatprep.mubr.msk.f32.mxu0 %vm275_vm1, %v249_v26 }
  0x35   : > { %950 = vmatmul.mubr.msk.f32.gmra.mrb[12].mxu1 %vm275_vm1, %v264_v30 }
  0x36   : > { %952 = vmatprep.mubr.msk.f32.mxu1 %vm275_vm1, %v265_v31 }
  0x37   : > { %929 = vmatmul.mubr.msk.f32.gmra.mrb[14].mxu0 %vm275_vm1, %v250_v29 }
  0x39   : > { %953 = vmatmul.mubr.msk.f32.gmra.mrb[14].mxu1 %vm275_vm1, %v266_v32 }
  0xee   : > { %v909_v35 = vpop.f32.mrb[0].mxu0 }
  0xef   : > { %v448_v36 = vadd.f32 %v909_v35, %v1263_v34  ;;  %v442_v37 = vpop.f32.mrb[1].mxu0 }
  0xf0   : > { %v443_v38 = vadd.f32 %v1263_v34, %v442_v37  ;;  %v933_v45 = vpop.f32.mrb[0].mxu1 }
  0xf1   : > { %603 = vst.msk [vmem:[%s1270_s22 + $0x8] sm:$0xff] %vm601_vm3, %v448_v36  ;;  %v642_v39 = vsel %vm601_vm3, %v448_v36, 0.0  ;;  %v1283_v47 = vadd.f32 %v933_v45, %v1263_v34  ;;  %v522_v48 = vpop.f32.mrb[1].mxu1 }
  0xf2   : > { %602 = vst.msk [vmem:[%s1270_s22] sm:$0xff] %vm601_vm3, %v443_v38  ;;  %v641_v40 = vsel %vm601_vm3, %v443_v38, 0.0  ;;  %v912_v41 = vpop.f32.mrb[2].mxu0  ;;  %v1288_v49 = vadd.f32 %v1263_v34, %v522_v48 }
  0xf3   : > { %v643_v42 = vadd.f32 %v642_v39, %v641_v40  ;;  %v458_v43 = vadd.f32 %v912_v41, %v1263_v34  ;;  %v452_v44 = vpop.f32.mrb[3].mxu0  ;;  %619 = vst.msk [vmem:[%s1270_s22 + $0x88] sm:$0xff] %vm601_vm3, %v1283_v47 }
  0xf4   : > { %v453_v46 = vadd.f32 %v1263_v34, %v452_v44  ;;  %618 = vst.msk [vmem:[%s1270_s22 + $0x80] sm:$0xff] %vm601_vm3, %v1288_v49  ;;  %v936_v55 = vpop.f32.mrb[2].mxu1 }
  0xf5   : > { %605 = vst.msk [vmem:[%s1270_s22 + $0x18] sm:$0xff] %vm601_vm3, %v458_v43  ;;  %v646_v56 = vsel %vm601_vm3, %v458_v43, 0.0  ;;  %v1303_v58 = vadd.f32 %v936_v55, %v1263_v34  ;;  %v532_v59 = vpop.f32.mrb[3].mxu1 }
  0xf6   : > { %604 = vst.msk [vmem:[%s1270_s22 + $0x10] sm:$0xff] %vm601_vm3, %v453_v46  ;;  %v644_v50 = vsel %vm601_vm3, %v453_v46, 0.0  ;;  %v915_v51 = vpop.f32.mrb[4].mxu0  ;;  %v1308_v61 = vadd.f32 %v1263_v34, %v532_v59 }
  0xf7   : > { %v645_v52 = vadd.f32 %v644_v50, %v643_v42  ;;  %v468_v53 = vadd.f32 %v915_v51, %v1263_v34  ;;  %v462_v54 = vpop.f32.mrb[5].mxu0  ;;  %621 = vst.msk [vmem:[%s1270_s22 + $0x98] sm:$0xff] %vm601_vm3, %v1303_v58 }
  0xf8   : > { %v463_v57 = vadd.f32 %v1263_v34, %v462_v54  ;;  %620 = vst.msk [vmem:[%s1270_s22 + $0x90] sm:$0xff] %vm601_vm3, %v1308_v61  ;;  %v939_v3 = vpop.f32.mrb[4].mxu1 }
  0xf9   : > { %607 = vst.msk [vmem:[%s1270_s22 + $0x28] sm:$0xff] %vm601_vm3, %v468_v53  ;;  %v647_v60 = vadd.f32 %v646_v56, %v645_v52  ;;  %v650_v4 = vsel %vm601_vm3, %v468_v53, 0.0  ;;  %v1323_v6 = vadd.f32 %v939_v3, %v1263_v34  ;;  %v542_v7 = vpop.f32.mrb[5].mxu1  ;;  %v672_v3 = vsel %vm601_vm3, %v1288_v49, 0.0 }
  0xfa   : > { %606 = vst.msk [vmem:[%s1270_s22 + $0x20] sm:$0xff] %vm601_vm3, %v463_v57  ;;  %v648_v62 = vsel %vm601_vm3, %v463_v57, 0.0  ;;  %v918_v63 = vpop.f32.mrb[6].mxu0  ;;  %v1328_v9 = vadd.f32 %v1263_v34, %v542_v7  ;;  %v678_v49 = vsel %vm601_vm3, %v1303_v58, 0.0 }
  0xfb   : > { %v649_v0 = vadd.f32 %v648_v62, %v647_v60  ;;  %v478_v1 = vadd.f32 %v918_v63, %v1263_v34  ;;  %v472_v2 = vpop.f32.mrb[7].mxu0  ;;  %623 = vst.msk [vmem:[%s1270_s22 + $0xa8] sm:$0xff] %vm601_vm3, %v1323_v6 }
  0xfc   : > { %v473_v5 = vadd.f32 %v1263_v34, %v472_v2  ;;  %622 = vst.msk [vmem:[%s1270_s22 + $0xa0] sm:$0xff] %vm601_vm3, %v1328_v9  ;;  %v942_v15 = vpop.f32.mrb[6].mxu1 }
  0xfd   : > { %609 = vst.msk [vmem:[%s1270_s22 + $0x38] sm:$0xff] %vm601_vm3, %v478_v1  ;;  %v651_v8 = vadd.f32 %v650_v4, %v649_v0  ;;  %v654_v16 = vsel %vm601_vm3, %v478_v1, 0.0  ;;  %v1343_v18 = vadd.f32 %v942_v15, %v1263_v34  ;;  %v552_v19 = vpop.f32.mrb[7].mxu1  ;;  %v680_v15 = vsel %vm601_vm3, %v1328_v9, 0.0 }
  0xfe   : > { %608 = vst.msk [vmem:[%s1270_s22 + $0x30] sm:$0xff] %vm601_vm3, %v473_v5  ;;  %v652_v10 = vsel %vm601_vm3, %v473_v5, 0.0  ;;  %v921_v11 = vpop.f32.mrb[8].mxu0  ;;  %v1348_v21 = vadd.f32 %v1263_v34, %v552_v19 }
  0xff   : > { %v653_v12 = vadd.f32 %v652_v10, %v651_v8  ;;  %v488_v13 = vadd.f32 %v921_v11, %v1263_v34  ;;  %v482_v14 = vpop.f32.mrb[9].mxu0  ;;  %625 = vst.msk [vmem:[%s1270_s22 + $0xb8] sm:$0xff] %vm601_vm3, %v1343_v18  ;;  %v674_v11 = vsel %vm601_vm3, %v1283_v47, 0.0 }
 0x100   : > { %v483_v17 = vadd.f32 %v1263_v34, %v482_v14  ;;  %624 = vst.msk [vmem:[%s1270_s22 + $0xb0] sm:$0xff] %vm601_vm3, %v1348_v21  ;;  %v945_v27 = vpop.f32.mrb[8].mxu1  ;;  %v684_v19 = vsel %vm601_vm3, %v1348_v21, 0.0 }
 0x101   : > { %611 = vst.msk [vmem:[%s1270_s22 + $0x48] sm:$0xff] %vm601_vm3, %v488_v13  ;;  %v655_v20 = vadd.f32 %v654_v16, %v653_v12  ;;  %v658_v28 = vsel %vm601_vm3, %v488_v13, 0.0  ;;  %v1363_v30 = vadd.f32 %v945_v27, %v1263_v34  ;;  %v562_v31 = vpop.f32.mrb[9].mxu1  ;;  %v676_v12 = vsel %vm601_vm3, %v1308_v61, 0.0 }
 0x102   : > { %610 = vst.msk [vmem:[%s1270_s22 + $0x40] sm:$0xff] %vm601_vm3, %v483_v17  ;;  %v656_v22 = vsel %vm601_vm3, %v483_v17, 0.0  ;;  %v924_v23 = vpop.f32.mrb[10].mxu0  ;;  %v563_v33 = vadd.f32 %v1263_v34, %v562_v31  ;;  %v682_v17 = vsel %vm601_vm3, %v1323_v6, 0.0  ;;  %v686_v61 = vsel %vm601_vm3, %v1343_v18, 0.0 }
 0x103   : > { %v657_v24 = vadd.f32 %v656_v22, %v655_v20  ;;  %v498_v25 = vadd.f32 %v924_v23, %v1263_v34  ;;  %v492_v26 = vpop.f32.mrb[11].mxu0  ;;  %627 = vst.msk [vmem:[%s1270_s22 + $0xc8] sm:$0xff] %vm601_vm3, %v1363_v30  ;;  %v690_v9 = vsel %vm601_vm3, %v1363_v30, 0.0 }
 0x104   : > { %v493_v29 = vadd.f32 %v1263_v34, %v492_v26  ;;  %626 = vst.msk [vmem:[%s1270_s22 + $0xc0] sm:$0xff] %vm601_vm3, %v563_v33  ;;  %v948_v40 = vpop.f32.mrb[10].mxu1  ;;  %v688_v22 = vsel %vm601_vm3, %v563_v33, 0.0 }
 0x105   : > { %613 = vst.msk [vmem:[%s1270_s22 + $0x58] sm:$0xff] %vm601_vm3, %v498_v25  ;;  %v659_v32 = vadd.f32 %v658_v28, %v657_v24  ;;  %v662_v41 = vsel %vm601_vm3, %v498_v25, 0.0  ;;  %v578_v43 = vadd.f32 %v948_v40, %v1263_v34  ;;  %v572_v44 = vpop.f32.mrb[11].mxu1  ;;  %v640_v40 = vld [vmem:[%s1256_s11] sm:$0x1] }
 0x106   : > { %612 = vst.msk [vmem:[%s1270_s22 + $0x50] sm:$0xff] %vm601_vm3, %v493_v29  ;;  %v660_v35 = vsel %vm601_vm3, %v493_v29, 0.0  ;;  %v927_v36 = vpop.f32.mrb[12].mxu0  ;;  %v573_v46 = vadd.f32 %v1263_v34, %v572_v44 }
 0x107   : > { %v661_v37 = vadd.f32 %v660_v35, %v659_v32  ;;  %v508_v38 = vadd.f32 %v927_v36, %v1263_v34  ;;  %v502_v39 = vpop.f32.mrb[13].mxu0  ;;  %629 = vst.msk [vmem:[%s1270_s22 + $0xd8] sm:$0xff] %vm601_vm3, %v578_v43  ;;  %v694_v6 = vsel %vm601_vm3, %v578_v43, 0.0 }
 0x108   : > { %v503_v42 = vadd.f32 %v1263_v34, %v502_v39  ;;  %628 = vst.msk [vmem:[%s1270_s22 + $0xd0] sm:$0xff] %vm601_vm3, %v573_v46  ;;  %v951_v54 = vpop.f32.mrb[12].mxu1  ;;  %v692_v24 = vsel %vm601_vm3, %v573_v46, 0.0 }
 0x109   : > { %615 = vst.msk [vmem:[%s1270_s22 + $0x68] sm:$0xff] %vm601_vm3, %v508_v38  ;;  %v663_v45 = vadd.f32 %v662_v41, %v661_v37  ;;  %v666_v55 = vsel %vm601_vm3, %v508_v38, 0.0  ;;  %v588_v57 = vadd.f32 %v951_v54, %v1263_v34  ;;  %v582_v59 = vpop.f32.mrb[13].mxu1 }
 0x10a   : > { %614 = vst.msk [vmem:[%s1270_s22 + $0x60] sm:$0xff] %vm601_vm3, %v503_v42  ;;  %v664_v48 = vsel %vm601_vm3, %v503_v42, 0.0  ;;  %v930_v50 = vpop.f32.mrb[14].mxu0  ;;  %v583_v62 = vadd.f32 %v1263_v34, %v582_v59 }
 0x10b   : > { %v665_v51 = vadd.f32 %v664_v48, %v663_v45  ;;  %v518_v52 = vadd.f32 %v930_v50, %v1263_v34  ;;  %v512_v53 = vpop.f32.mrb[15].mxu0  ;;  %631 = vst.msk [vmem:[%s1270_s22 + $0xe8] sm:$0xff] %vm601_vm3, %v588_v57  ;;  %v698_v28 = vsel %vm601_vm3, %v588_v57, 0.0 }
 0x10c   : > { %v513_v56 = vadd.f32 %v1263_v34, %v512_v53  ;;  %630 = vst.msk [vmem:[%s1270_s22 + $0xe0] sm:$0xff] %vm601_vm3, %v583_v62  ;;  %v954_v1 = vpop.f32.mrb[14].mxu1  ;;  %v696_v21 = vsel %vm601_vm3, %v583_v62, 0.0 }
 0x10d   : > { %617 = vst.msk [vmem:[%s1270_s22 + $0x78] sm:$0xff] %vm601_vm3, %v518_v52  ;;  %v667_v60 = vadd.f32 %v666_v55, %v665_v51  ;;  %v670_v2 = vsel %vm601_vm3, %v518_v52, 0.0  ;;  %v598_v4 = vadd.f32 %v954_v1, %v1263_v34  ;;  %v592_v5 = vpop.f32.mrb[15].mxu1 }
 0x10e   : > { %616 = vst.msk [vmem:[%s1270_s22 + $0x70] sm:$0xff] %vm601_vm3, %v513_v56  ;;  %v668_v63 = vsel %vm601_vm3, %v513_v56, 0.0  ;;  %v593_v8 = vadd.f32 %v1263_v34, %v592_v5 }
 0x10f   : > { %v669_v0 = vadd.f32 %v668_v63, %v667_v60  ;;  %633 = vst.msk [vmem:[%s1270_s22 + $0xf8] sm:$0xff] %vm601_vm3, %v598_v4  ;;  %v702_v32 = vsel %vm601_vm3, %v598_v4, 0.0 }
 0x110   : > { %632 = vst.msk [vmem:[%s1270_s22 + $0xf0] sm:$0xff] %vm601_vm3, %v593_v8  ;;  %v700_v29 = vsel %vm601_vm3, %v593_v8, 0.0 }
 0x111   : > { %v671_v7 = vadd.f32 %v670_v2, %v669_v0 }
 0x113   : > { %v673_v10 = vadd.f32 %v672_v3, %v671_v7 }
 0x115   : > { %v675_v13 = vadd.f32 %v674_v11, %v673_v10 }
 0x117   : > { %v677_v14 = vadd.f32 %v676_v12, %v675_v13 }
 0x119   : > { %v679_v34 = vadd.f32 %v678_v49, %v677_v14 }
 0x11b   : > { %v681_v16 = vadd.f32 %v680_v15, %v679_v34 }
 0x11d   : > { %v683_v47 = vadd.f32 %v682_v17, %v681_v16 }
 0x11f   : > { %v685_v20 = vadd.f32 %v684_v19, %v683_v47 }
 0x121   : > { %v687_v23 = vadd.f32 %v686_v61, %v685_v20 }
 0x123   : > { %v689_v58 = vadd.f32 %v688_v22, %v687_v23 }
 0x125   : > { %v691_v25 = vadd.f32 %v690_v9, %v689_v58 }
 0x127   : > { %v693_v26 = vadd.f32 %v692_v24, %v691_v25 }
 0x129   : > { %v695_v27 = vadd.f32 %v694_v6, %v693_v26 }
 0x12b   : > { %v697_v18 = vadd.f32 %v696_v21, %v695_v27 }
 0x12d   : > { %v699_v31 = vadd.f32 %v698_v28, %v697_v18 }
 0x12f   : > { %v701_v30 = vadd.f32 %v700_v29, %v699_v31 }
 0x131   : > { %v703_v33 = vadd.f32 %v702_v32, %v701_v30 }
 0x133   : > { %v704_v35 = vrot.slane %v703_v33, 4 }
 0x135   : > { %v705_v36 = vadd.f32 %v704_v35, %v703_v33 }
 0x137   : > { %v706_v37 = vrot.slane %v705_v36, 2 }
 0x139   : > { %v707_v38 = vadd.f32 %v706_v37, %v705_v36 }
 0x13b   : > { %v708_v39 = vrot.slane %v707_v38, 1 }
 0x13d   : > { %v709_v41 = vadd.f32 %v708_v39, %v707_v38 }
 0x13f   : > { %v710_v42 = vadd.f32 %v709_v41, %v640_v40 }
 0x141   : > { %712 = vst.msk [vmem:[%s1256_s11] sm:$0x1] %vm638_vm2, %v710_v42 }
 0x142   : > { %1026 = shalt.err (!%p1023_p5)
}
 0x143   : > { %s1027_s10 = scalar_lea.hbm %s1442_s5, 16  ;;  %s1031_s13 = scalar_lea.hbm %s1497_s4, 32 }
 0x144   : > { %p1028_p6 = scmp.ne.s32.totalorder %s1442_s5, %s1027_s10  ;;  %p1032_p10 = scmp.lt.u32.totalorder %s1442_s5, %s1497_s4 }
 0x145   : > { %p1033_p11 = scmp.lt.u32.totalorder %s1031_s13, %s1027_s10  ;;  %p1035_p13 = scmp.lt.u32.totalorder %s1027_s10, %s1442_s5 }
 0x146   : > { %p1029_p7 = pnand %p1028_p6, %p1160_p4 }
 0x147   : > { %p1034_p12 = por %p1033_p11, %p1032_p10 }
 0x148   : > { %p1030_p9 = pneg %p1029_p7 }
 0x149   : > { %p1036_p0 = por %p1035_p13, %p1034_p12 }
 0x14b   : > { %p1037_p1 = pnand %p1036_p0, %p1030_p9 }
 0x14d   : > { %1040 = shalt.err (!%p1037_p1)
}
 0x14e   : > { %957 = dma.vmem_to_hbm [thread:$0]  (%p1160_p4), %s1444_s26, 16, %s1442_s5, %s720_s6  }
 0x14f PF: > { %p963_p2 = scmp.ge.s32.totalorder %s1091_s20, 2  ;;  %s758_s22 = sand.u32 1, %s1071_s15  }
 0x150   : > { %s759_s24 = scalar_lea.sflag [#allocation3], %s758_s22 }
 0x151   : > { %p960_p3 = pnand %p963_p2, %p1167_p8 }
 0x153   : > { %1066 = dma.done.wait (!%p960_p3), %s759_s24, 16  }
 0x154   : > { %1068 = vsyncadd (!%p960_p3), %s759_s24, 4294967280  ;;  %s18_s20 = sadd.s32 1, %s1091_s20   ;;  %s1500_s15 = smov %s1075_s16 }
 0x155   : > { %p15_p5 = scmp.ge.s32.totalorder %s18_s20, 4   ;;  %s1501_s16 = smov %s1079_s17 }
 0x156   : > { %s1502_s17 = smov %s1173_s28  ;;  %s1503_s18 = smov %s1087_s19 }
 0x157   : > { %s1504_s19 = smov %s1506_s23  ;;  %17 = sbr.rel (!%p15_p5) target bundleno = 4 (0x4), region = 83 }
 0x15e   :  { %763 = vsyncpa [#allocation3], 1 }
 0x15f   :  { %765 = vsyncpa [#allocation3 + $0x1], 1 }

</bundles_post_ra>
